<compile_context>
chip_gen: v5e
topology: v5e:2x2
jax: 0.10.0
libtpu: 0.0.40
codegen_flags: <defaults>
</compile_context>

<pallas_src>
import functools

import jax
import jax.numpy as jnp
from jax.experimental import pallas as pl
from jax.experimental.pallas import tpu as pltpu

_SUBLANE = 8              # f32 sublane height
_MIN_ROWS_TO_SPLIT = 512  # enough rows -> force >=2 (even) tiles so v7x's 2 TCs both run


def _round_up(n, m):
    return (n + m - 1) // m * m


def mlp_softmax_kernel(x_ref, w1_ref, b1_ref, w2_ref, b2_ref, o_ref):
    """Fused Linear -> ReLU -> Linear -> Softmax on one (TM, F) batch tile."""
    # Cast x to the MXU compute dtype in-kernel (VPU; free filler under the DMA).
    x = x_ref[...].astype(w1_ref.dtype)
    # Layer 1: (TM, F) @ (F, H) + (1, H), f32 accumulation on the MXU.
    h = jnp.dot(x, w1_ref[...], preferred_element_type=jnp.float32)
    h = jnp.maximum(h + b1_ref[...], 0.0)
    # Layer 2: (TM, H) @ (H, O) + (1, O) -- O is NOT lane-padded; masked stores are
    # fine here because the kernel is bandwidth-bound, not store-slot-bound.
    logits = jnp.dot(h.astype(w2_ref.dtype), w2_ref[...],
                     preferred_element_type=jnp.float32)
    logits = logits + b2_ref[...]
    # Softmax over the last dim (exactly O valid lanes).
    m = jnp.max(logits, axis=-1, keepdims=True)
    e = jnp.exp(logits - m)
    s = jnp.sum(e, axis=-1, keepdims=True)
    inv = pl.reciprocal(s, approx=True)   # EUP vrcp (otherwise-idle slot)
    inv = inv * (2.0 - s * inv)           # one Newton step -> ~full f32 precision
    o_ref[...] = (e * inv).astype(o_ref.dtype)


def prepare_params(w1, b1, w2, b2, compute_dtype=jnp.bfloat16):
    """One-time parameter prep (hoisted out of the per-call forward).

    MXU operands (w1, w2) are cast to `compute_dtype` (bf16 by default: fast MXU path
    on v6e/v7x, safe on v5e); biases stay f32 (added to the f32 accumulator).
    """
    return (jnp.asarray(w1, compute_dtype), jnp.asarray(b1, jnp.float32),
            jnp.asarray(w2, compute_dtype), jnp.asarray(b2, jnp.float32))


@functools.partial(jax.jit, static_argnames=("tm",))
def batch_mlp_forward(x, w1, b1, w2, b2, *, tm=2048):
    """Forward pass of Batch_MLPModel. Returns softmax probabilities (B, O) in f32."""
    B, F = x.shape
    H = w1.shape[1]
    O = w2.shape[1]
    out_shape = jax.ShapeDtypeStruct((B, O), jnp.float32)

    # ---- balanced batch tiling (no wrapper-side padding of x) ----------------
    n_tiles = pl.cdiv(B, tm)
    if B >= _MIN_ROWS_TO_SPLIT:
        # Keep an even number of tiles (>= 2) so v7x's two TensorCores stay balanced.
        n_tiles = max(2, n_tiles)
        if n_tiles % 2:
            n_tiles += 1
    tm_eff = _round_up(pl.cdiv(B, n_tiles), _SUBLANE)  # balanced tile, <8 rows waste
    n_tiles = pl.cdiv(B, tm_eff)

    if n_tiles == 1:
        # Small batch: no grid -> no pipelining machinery, single VMEM-resident call.
        out = pl.pallas_call(
            mlp_softmax_kernel,
            out_shape=out_shape,
            in_specs=[pl.BlockSpec(memory_space=pltpu.MemorySpace.VMEM)] * 5,
            out_specs=pl.BlockSpec(memory_space=pltpu.MemorySpace.VMEM),
        )(x, w1, b1, w2, b2)
    else:
        # Large batch: tile the batch; weights stay VMEM-resident across the grid.
        # The partial last block (when B % tm_eff != 0) is masked by Pallas on store.
        # Scoped-VMEM limit raised explicitly (v5e default is only 16 MiB).
        vmem_limit = int(min(56 * 2**20, max(32 * 2**20, 6 * 1024 * tm_eff)))
        out = pl.pallas_call(
            mlp_softmax_kernel,
            out_shape=out_shape,
            grid=(n_tiles,),
            in_specs=[
                pl.BlockSpec((tm_eff, F), lambda i: (i, 0)),
                pl.BlockSpec((F, H), lambda i: (0, 0)),   # resident weights
                pl.BlockSpec((1, H), lambda i: (0, 0)),
                pl.BlockSpec((H, O), lambda i: (0, 0)),
                pl.BlockSpec((1, O), lambda i: (0, 0)),
            ],
            out_specs=pl.BlockSpec((tm_eff, O), lambda i: (i, 0)),
            compiler_params=pltpu.CompilerParams(
                dimension_semantics=("parallel",),   # batch tiles shard across TCs (v7x)
                vmem_limit_bytes=vmem_limit,
            ),
        )(x, w1, b1, w2, b2)
    return out


def init_params(key, input_size, hidden, output_size):
    # Deterministic init mimicking nn.Linear's uniform(-1/sqrt(fan_in), 1/sqrt(fan_in)).
    k1, k2, k3, k4 = jax.random.split(key, 4)
    bound1 = 1.0 / jnp.sqrt(input_size)
    bound2 = 1.0 / jnp.sqrt(hidden)
    w1 = jax.random.uniform(k1, (input_size, hidden), jnp.float32, -bound1, bound1)
    b1 = jax.random.uniform(k2, (1, hidden), jnp.float32, -bound1, bound1)
    w2 = jax.random.uniform(k3, (hidden, output_size), jnp.float32, -bound2, bound2)
    b2 = jax.random.uniform(k4, (1, output_size), jnp.float32, -bound2, bound2)
    return w1, b1, w2, b2


if __name__ == "__main__":
    key = jax.random.PRNGKey(0)
    kx, kp, kx2 = jax.random.split(key, 3)

    input_size = 32
    hidden = 128          # fixed by the module definition
    output_size = 16

    w1, b1, w2, b2 = init_params(kp, input_size, hidden, output_size)

    def reference(xin):
        h = jnp.maximum(xin @ w1 + b1, 0.0)
        return jax.nn.softmax(h @ w2 + b2, axis=1)

    # One-time parameter prep (outside the jitted forward).
    params_f32 = prepare_params(w1, b1, w2, b2, compute_dtype=jnp.float32)
    params_bf16 = prepare_params(w1, b1, w2, b2)  # bf16 MXU operands (default)

    # --- small batch: exercises the no-grid (single VMEM invocation) path ----
    x_small = jax.random.normal(kx, (8, input_size), jnp.float32)
    out_small = jax.block_until_ready(batch_mlp_forward(x_small, *params_f32))
    ref_small = reference(x_small)
    assert out_small.shape == (8, output_size)
    assert jnp.allclose(out_small, ref_small, atol=1e-5, rtol=1e-5)
    assert jnp.allclose(jnp.sum(out_small, axis=1), 1.0, atol=1e-5)

    # --- larger, non-divisible batch: tiled 'parallel' grid, balanced tiles,
    #     partial (masked) last block, unpadded (B, 16) output ----------------
    x_big = jax.random.normal(kx2, (1000, input_size), jnp.float32)
    out_big = jax.block_until_ready(batch_mlp_forward(x_big, *params_f32))
    ref_big = reference(x_big)
    assert out_big.shape == (1000, output_size)
    assert jnp.allclose(out_big, ref_big, atol=1e-5, rtol=1e-5)
    assert jnp.allclose(jnp.sum(out_big, axis=1), 1.0, atol=1e-5)

    # --- bf16 MXU operands (default fast path on v6e/v7x), f32 accumulation;
    #     x stays f32 in HBM and is cast inside the kernel --------------------
    out_bf16 = jax.block_until_ready(batch_mlp_forward(x_big, *params_bf16))
    assert out_bf16.shape == (1000, output_size)
    assert jnp.allclose(out_bf16, ref_big, atol=3e-2)
    assert jnp.allclose(jnp.sum(out_bf16, axis=1), 1.0, atol=1e-3)

    print("KERNEL_OK")
</pallas_src>

<mosaic_0001>
module attributes {stable_mosaic.version = 11 : i64} {
  func.func @mlp_softmax_kernel(%arg0: memref<8x32xf32, #tpu.memory_space<vmem>>, %arg1: memref<32x128xf32, #tpu.memory_space<vmem>>, %arg2: memref<1x128xf32, #tpu.memory_space<vmem>>, %arg3: memref<128x16xf32, #tpu.memory_space<vmem>>, %arg4: memref<1x16xf32, #tpu.memory_space<vmem>>, %arg5: memref<8x16xf32, #tpu.memory_space<vmem>>) attributes {dimension_semantics = [], scalar_prefetch = 0 : i64, scratch_operands = 0 : i64, tpu.core_type = #tpu.core_type<tc>} {
    %c0 = arith.constant 0 : index
    %c0_0 = arith.constant 0 : index
    %0 = vector.load %arg0[%c0, %c0_0] : memref<8x32xf32, #tpu.memory_space<vmem>>, vector<8x32xf32>
    %c0_1 = arith.constant 0 : index
    %c0_2 = arith.constant 0 : index
    %1 = vector.load %arg1[%c0_1, %c0_2] : memref<32x128xf32, #tpu.memory_space<vmem>>, vector<32x128xf32>
    %cst = arith.constant dense<0.000000e+00> : vector<8x128xf32>
    %2 = tpu.matmul %0, %1, %cst {dimension_numbers = #tpu.dot_dimension_numbers<[1], [0], [0], [1], [0, 0, 1, 1], [], []>} : vector<8x32xf32>, vector<32x128xf32>, vector<8x128xf32> -> vector<8x128xf32>
    %c0_3 = arith.constant 0 : index
    %c0_4 = arith.constant 0 : index
    %3 = vector.load %arg2[%c0_3, %c0_4] : memref<1x128xf32, #tpu.memory_space<vmem>>, vector<1x128xf32>
    %4 = vector.broadcast %3 : vector<1x128xf32> to vector<8x128xf32>
    %5 = arith.addf %2, %4 : vector<8x128xf32>
    %cst_5 = arith.constant 0.000000e+00 : f32
    %6 = vector.broadcast %cst_5 : f32 to vector<8x128xf32>
    %7 = arith.maximumf %5, %6 : vector<8x128xf32>
    %c0_6 = arith.constant 0 : index
    %c0_7 = arith.constant 0 : index
    %8 = vector.load %arg3[%c0_6, %c0_7] : memref<128x16xf32, #tpu.memory_space<vmem>>, vector<128x16xf32>
    %cst_8 = arith.constant dense<0.000000e+00> : vector<8x16xf32>
    %9 = tpu.matmul %7, %8, %cst_8 {dimension_numbers = #tpu.dot_dimension_numbers<[1], [0], [0], [1], [0, 0, 1, 1], [], []>} : vector<8x128xf32>, vector<128x16xf32>, vector<8x16xf32> -> vector<8x16xf32>
    %c0_9 = arith.constant 0 : index
    %c0_10 = arith.constant 0 : index
    %10 = vector.load %arg4[%c0_9, %c0_10] : memref<1x16xf32, #tpu.memory_space<vmem>>, vector<1x16xf32>
    %11 = vector.broadcast %10 : vector<1x16xf32> to vector<8x16xf32>
    %12 = arith.addf %9, %11 : vector<8x16xf32>
    %cst_11 = arith.constant dense<0xFF800000> : vector<8xf32>
    %13 = vector.multi_reduction <maximumf>, %12, %cst_11 [1] : vector<8x16xf32> to vector<8xf32>
    %14 = vector.shape_cast %13 : vector<8xf32> to vector<8x1xf32>
    %15 = vector.broadcast %14 : vector<8x1xf32> to vector<8x16xf32>
    %16 = arith.subf %12, %15 : vector<8x16xf32>
    %17 = math.exp %16 : vector<8x16xf32>
    %cst_12 = arith.constant dense<0.000000e+00> : vector<8xf32>
    %18 = vector.multi_reduction <add>, %17, %cst_12 [1] : vector<8x16xf32> to vector<8xf32>
    %19 = vector.shape_cast %18 : vector<8xf32> to vector<8x1xf32>
    %20 = tpu.reciprocal %19 {approx = true} : vector<8x1xf32> -> vector<8x1xf32>
    %21 = arith.mulf %19, %20 : vector<8x1xf32>
    %cst_13 = arith.constant 2.000000e+00 : f32
    %22 = vector.broadcast %cst_13 : f32 to vector<8x1xf32>
    %23 = arith.subf %22, %21 : vector<8x1xf32>
    %24 = arith.mulf %20, %23 : vector<8x1xf32>
    %25 = vector.broadcast %24 : vector<8x1xf32> to vector<8x16xf32>
    %26 = arith.mulf %17, %25 : vector<8x16xf32>
    %c0_14 = arith.constant 0 : index
    %c0_15 = arith.constant 0 : index
    %27 = vector.load %arg5[%c0_14, %c0_15] : memref<8x16xf32, #tpu.memory_space<vmem>>, vector<8x16xf32>
    tpu.vector_store %arg5[%c0_14, %c0_15], %26 {strides = array<i32>} : memref<8x16xf32, #tpu.memory_space<vmem>>, vector<8x16xf32>,
    return
  }
}

</mosaic_0001>

<bundles_post_ra>
// kernel: batch_mlp_forward.1
= control target key start
LH: loop header
LB: loop body
LE: loop exit
PB: predicated region body
PF: predicated region fallthrough
CT: control target
= control target key end

     0   :  { %vm30_vm0 = vcmask 261120   ;;  %s267_s0 = inlined_call_operand.vmem [shape: f32[8,32], index: 0, kind: input, shape index: {}]   ;;  %s268_s1 = inlined_call_operand.vmem [shape: f32[32,128], index: 1, kind: input, shape index: {}]   ;;  %s269_s2 = inlined_call_operand.vmem [shape: f32[1,128], index: 2, kind: input, shape index: {}]   ;;  %s270_s3 = inlined_call_operand.vmem [shape: f32[128,16], index: 3, kind: input, shape index: {}]   ;;  %s271_s4 = inlined_call_operand.vmem [shape: f32[1,16], index: 4, kind: input, shape index: {}]   ;;  %s272_s5 = inlined_call_operand.hbm [shape: f32[8,16], index: 5, kind: output, shape index: {}]  }
   0x1   :  { %v25_v0 = vld [vmem:[%s268_s1 + $0x18] sm:$0xff]  ;;  %v24_v1 = vld [vmem:[%s268_s1 + $0x10] sm:$0xff]  ;;  %v23_v3 = vld [vmem:[%s268_s1 + $0x8] sm:$0xff] }
   0x2   :  { %46 = vmatpush.msra.mxu0 %v25_v0  ;;  %v70_v2 = vld [vmem:[%s270_s3 + $0x78] sm:$0xff]  ;;  %v69_v4 = vld [vmem:[%s270_s3 + $0x70] sm:$0xff]  ;;  %v68_v5 = vld [vmem:[%s270_s3 + $0x68] sm:$0xff] }
   0x3   :  { %75 = vmatpush.msra.mxu1 %v70_v2  ;;  %v22_v6 = vld [vmem:[%s268_s1] sm:$0xff]  ;;  %v66_v9 = vld [vmem:[%s270_s3 + $0x58] sm:$0xff] }
   0x4   :  { %47 = vmatpush.msra.mxu0 %v24_v1  ;;  %v21_v7 = vld [vmem:[%s267_s0] sm:$0xff] }
   0x5   :  { %76 = vmatpush.msra.mxu1 %v69_v4  ;;  %v67_v8 = vld [vmem:[%s270_s3 + $0x60] sm:$0xff] }
   0x6   :  { %48 = vmatpush.msra.mxu0 %v23_v3 }
   0x7   :  { %77 = vmatpush.msra.mxu1 %v68_v5 }
   0x8   :  { %49 = vmatpush.msra.mxu0 %v22_v6 }
   0x9   :  { %10 = vsyncpa [#allocation3], 0  ;;  %127 = vmatmul.msk.f32.vlgmr.msra.gmra.mxu0 %vm30_vm0, %v21_v7  ;;  %78 = vmatpush.msra.mxu1 %v67_v8  ;;  %v65_v10 = vld [vmem:[%s270_s3 + $0x50] sm:$0xff]  ;;  %v64_v11 = vld [vmem:[%s270_s3 + $0x48] sm:$0xff]  ;;  %vm95_vm1 = vcmask 130048   ;;  %s118_s1 = sshll.u32 %s272_s5, 4  ;;  %s119_s1 = int_to_ptr.hbm [resolvable:$true] %s118_s1 }
   0xa   :  { %v63_v12 = vld [vmem:[%s270_s3 + $0x40] sm:$0xff]  ;;  %v62_v13 = vld [vmem:[%s270_s3 + $0x38] sm:$0xff]  ;;  %v61_v14 = vld [vmem:[%s270_s3 + $0x30] sm:$0xff] }
   0xb   :  { %79 = vmatpush.msra.mxu1 %v66_v9  ;;  %v60_v15 = vld [vmem:[%s270_s3 + $0x28] sm:$0xff]  ;;  %v59_v16 = vld [vmem:[%s270_s3 + $0x20] sm:$0xff]  ;;  %v58_v17 = vld [vmem:[%s270_s3 + $0x18] sm:$0xff] }
   0xc   :  { %v57_v18 = vld [vmem:[%s270_s3 + $0x10] sm:$0xff]  ;;  %v56_v19 = vld [vmem:[%s270_s3 + $0x8] sm:$0xff]  ;;  %v55_v20 = vld [vmem:[%s270_s3] sm:$0xff] }
   0xd   :  { %80 = vmatpush.msra.mxu1 %v65_v10  ;;  %v129_v21 = vld [vmem:[%s269_s2] ss:$0 sm:$0xff]  ;;  %s161_s2 = smov [#allocation2]  }
   0xe   :  { %v130_v25 = vld [vmem:[%s271_s4] ss:$0 sm:$0xff]  ;;  %s116_s3 = sshll.u32 %s161_s2, 4  ;;  %s117_s3 = int_to_ptr.vmem [resolvable:$true] %s116_s3 }
   0xf   :  { %81 = vmatpush.msra.mxu1 %v64_v11 }
  0x11   :  { %82 = vmatpush.msra.mxu1 %v63_v12 }
  0x13   :  { %83 = vmatpush.msra.mxu1 %v62_v13 }
  0x15   :  { %84 = vmatpush.msra.mxu1 %v61_v14 }
  0x17   :  { %85 = vmatpush.msra.mxu1 %v60_v15 }
  0x19   :  { %86 = vmatpush.msra.mxu1 %v59_v16 }
  0x1b   :  { %87 = vmatpush.msra.mxu1 %v58_v17 }
  0x1d   :  { %88 = vmatpush.msra.mxu1 %v57_v18 }
  0x1f   :  { %89 = vmatpush.msra.mxu1 %v56_v19 }
  0x21   :  { %90 = vmatpush.msra.mxu1 %v55_v20 }
  0x86   :  { %v51_v22 = vpop.f32.mrf.mxu0 }
  0x87   :  { %v52_v23 = vadd.f32 %v129_v21, %v51_v22 }
  0x89   :  { %v54_v24 = vmax.f32 %v52_v23, 0.0 }
  0x8b   :  { %91 = vmatmul.f32.vlgmr.msra.gmra.mxu1 %v54_v24 }
 0x108   :  { %v92_v26 = vpop.f32.mrf.mxu1 }
 0x109   :  { %v93_v27 = vadd.f32 %v130_v25, %v92_v26 }
 0x10b   :  { %v96_v28 = vsel %vm95_vm1, %v93_v27, -inf }
 0x10c   :  { %97 = vmax.xlane.f32.xlu0 %v96_v28 }
 0x17f   :  { %v98_v29 = vpop.xlane.xlu0 %97 }
 0x180   :  { %v99_v30 = vsub.f32 %v93_v27, %v98_v29 }
 0x182   :  { %v100_v31 = vmul.f32 1.442695, %v99_v30 }
 0x184   :  { %131 = vpow2.f32 %v100_v31 }
 0x18a   :  { %v132_v32 = vpop.eup %131 }
 0x18b   :  { %v102_v33 = vsel %vm95_vm1, %v132_v32, 0.0 }
 0x18c   :  { %103 = vadd.xlane.f32.xlu0 %v102_v33 }
 0x1ff   :  { %v104_v34 = vpop.xlane.xlu0 %103 }
 0x200   :  { %133 = vrcp.f32 %v104_v34 }
 0x206   :  { %v134_v35 = vpop.eup %133 }
 0x207   :  { %v106_v36 = vmul.f32 %v134_v35, %v104_v34 }
 0x209   :  { %v107_v37 = vsub.f32 2.0, %v106_v36 }
 0x20b   :  { %v108_v38 = vmul.f32 %v134_v35, %v107_v37 }
 0x20d   :  { %v109_v39 = vmul.f32 %v132_v32, %v108_v38 }
 0x20f   :  { %110 = vst.msk [vmem:[#allocation2] sm:$0xff] %vm95_vm1, %v109_v39 }
 0x210   :  { %121 = dma.vmem_to_hbm [thread:$0]  %s117_s3, 128, %s119_s1, [#allocation3]  }
 0x211   :  { %159 = dma.done.wait [#allocation3], 128  }
 0x212   :  { %160 = vsyncadd [#allocation3], 4294967168 }
 0x213   :  { %126 = vsyncpa [#allocation3], 1 }

</bundles_post_ra>
